<compile_context>
chip_gen: v6e
topology: v6e:2x2x1
jax: 0.10.0
libtpu: 0.0.40
codegen_flags: <defaults>
</compile_context>

<pallas_src>
from functools import partial

import jax
import jax.numpy as jnp
import numpy as np
from jax.experimental import pallas as pl
from jax.experimental.pallas import tpu as pltpu


def _block_kernel(patches_ref, xchw_ref, w1_ref, wr_ref, br_ref, awt_ref, ah_ref,
                  o_ref, *, cin, h, ho, wo, eps):
    s = ho * wo
    # --- conv1: 3x3 / stride-2 conv as one GEMM: (Cout, 9Cin) @ (9Cin, S) ----
    conv = jnp.dot(w1_ref[...], patches_ref[0],
                   preferred_element_type=jnp.float32)            # (Cout, S) f32
    # --- InstanceNorm2d (no affine) + ReLU; one-pass stats in f32 ------------
    inv_s = 1.0 / float(s)
    mean = jnp.sum(conv, axis=1, keepdims=True) * inv_s
    msq = jnp.sum(conv * conv, axis=1, keepdims=True) * inv_s
    var = jnp.maximum(msq - mean * mean, 0.0)
    act = jnp.maximum((conv - mean) * jax.lax.rsqrt(var + eps), 0.0)

    # --- residual: separable bilinear resize (align_corners), then 1x1 conv --
    # W-resize: (Cin*H, W) @ (W, Wo) -> (Cin*H, Wo)
    t = jnp.dot(xchw_ref[0], awt_ref[...],
                preferred_element_type=jnp.float32)
    t3 = t.reshape(cin, h, wo).astype(jnp.bfloat16)                # cheap: H%8==0
    # H-resize as a channel-batched matmul: (Cin, Ho, H) @ (Cin, H, Wo)
    ah_b = jnp.broadcast_to(ah_ref[...], (cin, ho, h))
    r = jax.lax.dot_general(ah_b, t3, (((2,), (1,)), ((0,), (0,))),
                            preferred_element_type=jnp.float32)    # (Cin, Ho, Wo)
    r2 = r.reshape(cin, s).astype(jnp.bfloat16)
    # 1x1 conv on the SMALL grid (Ho*Wo rows); bias after the resize (exact).
    res = jnp.dot(wr_ref[...], r2,
                  preferred_element_type=jnp.float32) + br_ref[...]  # (Cout, S)

    o_ref[0] = act + res


def _interp_matrix(out_sz, in_sz):
    """A (out_sz, in_sz) s.t. A @ v is 1-D bilinear resize, align_corners=True."""
    if out_sz == 1:
        src = jnp.zeros((1,), jnp.float32)
    else:
        src = jnp.arange(out_sz, dtype=jnp.float32) * (in_sz - 1) / (out_sz - 1)
    i0 = jnp.clip(jnp.floor(src).astype(jnp.int32), 0, in_sz - 1)
    i1 = jnp.clip(i0 + 1, 0, in_sz - 1)
    frac = src - i0.astype(jnp.float32)
    cols = jnp.arange(in_sz)
    m = ((cols[None, :] == i0[:, None]) * (1.0 - frac)[:, None]
         + (cols[None, :] == i1[:, None]) * frac[:, None])
    return m.astype(jnp.float32)


def small_discriminator_block(x_nchw, params, *, eps=1e-5):
    """Forward pass of SmallDiscriminatorBlock. Input/Output layout: NCHW."""
    N, Cin, H, W = x_nchw.shape
    w1, wr, br = params["w1"], params["wr"], params["br"]
    Cout = w1.shape[0]
    Ho = (H + 2 - 3) // 2 + 1            # reflection-pad 1, k=3, stride=2
    Wo = (W + 2 - 3) // 2 + 1
    S = Ho * Wo                          # NOTE: at production sizes S, W should
                                         # be multiples of 128 (pad + mask stats)

    x = x_nchw.astype(jnp.float32)

    # ------ glue: channel-major im2col + constants (kernel inputs in bf16) ---
    xp = jnp.pad(x, ((0, 0), (0, 0), (1, 1), (1, 1)), mode="reflect")
    taps = [xp[:, :, ki:ki + 2 * Ho - 1:2, kj:kj + 2 * Wo - 1:2]
            for ki in range(3) for kj in range(3)]                 # 9 x (N,Cin,Ho,Wo)
    patches = jnp.stack(taps, axis=1).reshape(N, 9 * Cin, S).astype(jnp.bfloat16)

    x_chw = x.reshape(N, Cin * H, W).astype(jnp.bfloat16)          # free reshape of NCHW

    # weight flattening matches patches index tap*Cin + c with tap = ki*3 + kj
    w1_mat = jnp.transpose(w1, (0, 2, 3, 1)).reshape(Cout, 9 * Cin).astype(jnp.bfloat16)
    wr_mat = wr.reshape(Cout, Cin).astype(jnp.bfloat16)
    br_col = br.reshape(Cout, 1).astype(jnp.float32)
    # conv1 bias b1 is intentionally NOT passed: cancelled by InstanceNorm.

    awt = _interp_matrix(Wo, W).T.astype(jnp.bfloat16)             # (W, Wo)
    ah = _interp_matrix(Ho, H).astype(jnp.bfloat16)                # (Ho, H)

    kernel = partial(_block_kernel, cin=Cin, h=H, ho=Ho, wo=Wo, eps=eps)

    out = pl.pallas_call(
        kernel,
        out_shape=jax.ShapeDtypeStruct((N, Cout, S), jnp.float32),
        grid_spec=pltpu.PrefetchScalarGridSpec(
            num_scalar_prefetch=0,
            grid=(N,),
            in_specs=[
                pl.BlockSpec((1, 9 * Cin, S), lambda b: (b, 0, 0)),
                pl.BlockSpec((1, Cin * H, W), lambda b: (b, 0, 0)),
                pl.BlockSpec((Cout, 9 * Cin), lambda b: (0, 0)),
                pl.BlockSpec((Cout, Cin), lambda b: (0, 0)),
                pl.BlockSpec((Cout, 1), lambda b: (0, 0)),
                pl.BlockSpec((W, Wo), lambda b: (0, 0)),
                pl.BlockSpec((Ho, H), lambda b: (0, 0)),
            ],
            out_specs=pl.BlockSpec((1, Cout, S), lambda b: (b, 0, 0)),
        ),
        compiler_params=pltpu.CompilerParams(
            dimension_semantics=("parallel",),
            vmem_limit_bytes=48 * 1024 * 1024),
    )(patches, x_chw, w1_mat, wr_mat, br_col, awt, ah)

    return out.reshape(N, Cout, Ho, Wo)                            # already NCHW


def _spectral_normalize(w, iters=30):
    # TODO(synk): torch spectral_norm uses a single persistent power-iteration
    # step per forward; here we normalize by the (converged) leading singular value.
    mat = w.reshape(w.shape[0], -1)
    v = jnp.ones((mat.shape[1],), jnp.float32) / jnp.sqrt(float(mat.shape[1]))
    for _ in range(iters):
        u = mat @ v
        u = u / (jnp.linalg.norm(u) + 1e-12)
        v = mat.T @ u
        v = v / (jnp.linalg.norm(v) + 1e-12)
    sigma = u @ (mat @ v)
    return w / sigma


def init_params(key, in_c, out_c):
    k1, k2, k3, k4 = jax.random.split(key, 4)
    std1 = (2.0 / (in_c * 9 + out_c * 9)) ** 0.5
    w1 = jax.random.normal(k1, (out_c, in_c, 3, 3), jnp.float32) * std1
    stdr = (2.0 / (in_c + out_c)) ** 0.5
    wr = jax.random.normal(k2, (out_c, in_c, 1, 1), jnp.float32) * stdr
    bound1 = 1.0 / (in_c * 9) ** 0.5
    b1 = jax.random.uniform(k3, (out_c,), jnp.float32, minval=-bound1, maxval=bound1)
    boundr = 1.0 / in_c ** 0.5
    br = jax.random.uniform(k4, (out_c,), jnp.float32, minval=-boundr, maxval=boundr)
    return dict(w1=_spectral_normalize(w1), b1=b1,
                wr=_spectral_normalize(wr), br=br)


def _reference(x_nchw, params, eps=1e-5):
    """Pure-JAX f32 reference mirroring the PyTorch forward (includes b1 to
    verify that dropping it in the kernel is exact under InstanceNorm)."""
    w1, b1, wr, br = params["w1"], params["b1"], params["wr"], params["br"]
    N, Cin, H, W = x_nchw.shape
    Cout = w1.shape[0]
    i = jnp.einsum("nchw,oc->nohw", x_nchw, wr.reshape(Cout, Cin)) + br[None, :, None, None]
    xp = jnp.pad(x_nchw, ((0, 0), (0, 0), (1, 1), (1, 1)), mode="reflect")
    conv = jax.lax.conv_general_dilated(
        xp, w1, window_strides=(2, 2), padding="VALID",
        dimension_numbers=("NCHW", "OIHW", "NCHW")) + b1[None, :, None, None]
    mean = conv.mean(axis=(2, 3), keepdims=True)
    var = ((conv - mean) ** 2).mean(axis=(2, 3), keepdims=True)
    act = jnp.maximum((conv - mean) / jnp.sqrt(var + eps), 0.0)
    Ho, Wo = act.shape[2], act.shape[3]
    Ah, Aw = _interp_matrix(Ho, H), _interp_matrix(Wo, W)
    i_res = jnp.einsum("oh,nchw,pw->ncop", Ah, i, Aw)
    return i_res + act


if __name__ == "__main__":
    key = jax.random.PRNGKey(0)
    kx, kp = jax.random.split(key)

    N, in_c, out_c, H, W = 2, 4, 8, 16, 16
    x = jax.random.normal(kx, (N, in_c, H, W), jnp.float32)
    params = init_params(kp, in_c, out_c)

    out = jax.block_until_ready(small_discriminator_block(x, params))
    ref = jax.block_until_ready(_reference(x, params))

    assert out.shape == (N, out_c, 8, 8), out.shape
    # Kernel feeds the MXU bf16 inputs (7-bit mantissa) with f32 accumulation;
    # the reference is pure f32, so tolerances are set accordingly.
    np.testing.assert_allclose(np.asarray(out), np.asarray(ref), rtol=5e-2, atol=5e-2)

    print("KERNEL_OK")
</pallas_src>

<mosaic_0001>
module attributes {stable_mosaic.version = 11 : i64} {
  func.func @_block_kernel(%arg0: i32, %arg1: memref<1x36x64xbf16, #tpu.memory_space<vmem>>, %arg2: memref<1x64x16xbf16, #tpu.memory_space<vmem>>, %arg3: memref<8x36xbf16, #tpu.memory_space<vmem>>, %arg4: memref<8x4xbf16, #tpu.memory_space<vmem>>, %arg5: memref<8x1xf32, #tpu.memory_space<vmem>>, %arg6: memref<16x8xbf16, #tpu.memory_space<vmem>>, %arg7: memref<8x16xbf16, #tpu.memory_space<vmem>>, %arg8: memref<1x8x64xf32, #tpu.memory_space<vmem>>) attributes {dimension_semantics = [#tpu.dimension_semantics<parallel>], iteration_bounds = array<i64: 2>, scalar_prefetch = 0 : i64, scratch_operands = 0 : i64, tpu.core_type = #tpu.core_type<tc>, window_params = [{transform_indices = @transform_0, window_bounds = array<i64: 1, 36, 64>}, {transform_indices = @transform_1, window_bounds = array<i64: 1, 64, 16>}, {pipeline_mode = #tpu.pipeline_mode<synchronous>, transform_indices = @transform_2, window_bounds = array<i64: 8, 36>}, {pipeline_mode = #tpu.pipeline_mode<synchronous>, transform_indices = @transform_3, window_bounds = array<i64: 8, 4>}, {pipeline_mode = #tpu.pipeline_mode<synchronous>, transform_indices = @transform_4, window_bounds = array<i64: 8, 1>}, {pipeline_mode = #tpu.pipeline_mode<synchronous>, transform_indices = @transform_5, window_bounds = array<i64: 16, 8>}, {pipeline_mode = #tpu.pipeline_mode<synchronous>, transform_indices = @transform_6, window_bounds = array<i64: 8, 16>}, {transform_indices = @transform_7, window_bounds = array<i64: 1, 8, 64>}]} {
    %c0 = arith.constant 0 : index
    %c0_0 = arith.constant 0 : index
    %0 = vector.load %arg3[%c0, %c0_0] : memref<8x36xbf16, #tpu.memory_space<vmem>>, vector<8x36xbf16>
    %c0_1 = arith.constant 0 : index
    %c0_2 = arith.constant 0 : index
    %c0_3 = arith.constant 0 : index
    %1 = vector.load %arg1[%c0_1, %c0_2, %c0_3] : memref<1x36x64xbf16, #tpu.memory_space<vmem>>, vector<1x36x64xbf16>
    %2 = vector.shape_cast %1 : vector<1x36x64xbf16> to vector<36x64xbf16>
    %cst = arith.constant dense<0.000000e+00> : vector<8x64xf32>
    %3 = tpu.matmul %0, %2, %cst {dimension_numbers = #tpu.dot_dimension_numbers<[1], [0], [0], [1], [0, 0, 1, 1], [], []>} : vector<8x36xbf16>, vector<36x64xbf16>, vector<8x64xf32> -> vector<8x64xf32>
    %cst_4 = arith.constant dense<0.000000e+00> : vector<8xf32>
    %4 = vector.multi_reduction <add>, %3, %cst_4 [1] : vector<8x64xf32> to vector<8xf32>
    %5 = vector.shape_cast %4 : vector<8xf32> to vector<8x1xf32>
    %cst_5 = arith.constant 1.562500e-02 : f32
    %6 = vector.broadcast %cst_5 : f32 to vector<8x1xf32>
    %7 = arith.mulf %5, %6 : vector<8x1xf32>
    %8 = arith.mulf %3, %3 : vector<8x64xf32>
    %cst_6 = arith.constant dense<0.000000e+00> : vector<8xf32>
    %9 = vector.multi_reduction <add>, %8, %cst_6 [1] : vector<8x64xf32> to vector<8xf32>
    %10 = vector.shape_cast %9 : vector<8xf32> to vector<8x1xf32>
    %cst_7 = arith.constant 1.562500e-02 : f32
    %11 = vector.broadcast %cst_7 : f32 to vector<8x1xf32>
    %12 = arith.mulf %10, %11 : vector<8x1xf32>
    %13 = arith.mulf %7, %7 : vector<8x1xf32>
    %14 = arith.subf %12, %13 : vector<8x1xf32>
    %cst_8 = arith.constant 0.000000e+00 : f32
    %15 = vector.broadcast %cst_8 : f32 to vector<8x1xf32>
    %16 = arith.maximumf %14, %15 : vector<8x1xf32>
    %17 = vector.broadcast %7 : vector<8x1xf32> to vector<8x64xf32>
    %18 = arith.subf %3, %17 : vector<8x64xf32>
    %cst_9 = arith.constant 9.99999974E-6 : f32
    %19 = vector.broadcast %cst_9 : f32 to vector<8x1xf32>
    %20 = arith.addf %16, %19 : vector<8x1xf32>
    %21 = math.rsqrt %20 : vector<8x1xf32>
    %22 = vector.broadcast %21 : vector<8x1xf32> to vector<8x64xf32>
    %23 = arith.mulf %18, %22 : vector<8x64xf32>
    %cst_10 = arith.constant 0.000000e+00 : f32
    %24 = vector.broadcast %cst_10 : f32 to vector<8x64xf32>
    %25 = arith.maximumf %23, %24 : vector<8x64xf32>
    %c0_11 = arith.constant 0 : index
    %c0_12 = arith.constant 0 : index
    %c0_13 = arith.constant 0 : index
    %26 = vector.load %arg2[%c0_11, %c0_12, %c0_13] : memref<1x64x16xbf16, #tpu.memory_space<vmem>>, vector<1x64x16xbf16>
    %27 = vector.shape_cast %26 : vector<1x64x16xbf16> to vector<64x16xbf16>
    %c0_14 = arith.constant 0 : index
    %c0_15 = arith.constant 0 : index
    %28 = vector.load %arg6[%c0_14, %c0_15] : memref<16x8xbf16, #tpu.memory_space<vmem>>, vector<16x8xbf16>
    %cst_16 = arith.constant dense<0.000000e+00> : vector<64x8xf32>
    %29 = tpu.matmul %27, %28, %cst_16 {dimension_numbers = #tpu.dot_dimension_numbers<[1], [0], [0], [1], [0, 0, 1, 1], [], []>} : vector<64x16xbf16>, vector<16x8xbf16>, vector<64x8xf32> -> vector<64x8xf32>
    %30 = vector.shape_cast %29 : vector<64x8xf32> to vector<4x16x8xf32>
    %31 = arith.truncf %30 : vector<4x16x8xf32> to vector<4x16x8xbf16>
    %c0_17 = arith.constant 0 : index
    %c0_18 = arith.constant 0 : index
    %32 = vector.load %arg7[%c0_17, %c0_18] : memref<8x16xbf16, #tpu.memory_space<vmem>>, vector<8x16xbf16>
    %33 = vector.shape_cast %32 : vector<8x16xbf16> to vector<1x8x16xbf16>
    %34 = vector.broadcast %33 : vector<1x8x16xbf16> to vector<4x8x16xbf16>
    %cst_19 = arith.constant dense<0.000000e+00> : vector<4x8x8xf32>
    %35 = tpu.matmul %34, %31, %cst_19 {dimension_numbers = #tpu.dot_dimension_numbers<[2], [1], [1], [2], [0, 0, 0, 1, 1, 2], [0], [0]>} : vector<4x8x16xbf16>, vector<4x16x8xbf16>, vector<4x8x8xf32> -> vector<4x8x8xf32>
    %36 = vector.shape_cast %35 : vector<4x8x8xf32> to vector<4x64xf32>
    %37 = arith.truncf %36 : vector<4x64xf32> to vector<4x64xbf16>
    %c0_20 = arith.constant 0 : index
    %c0_21 = arith.constant 0 : index
    %38 = vector.load %arg4[%c0_20, %c0_21] : memref<8x4xbf16, #tpu.memory_space<vmem>>, vector<8x4xbf16>
    %cst_22 = arith.constant dense<0.000000e+00> : vector<8x64xf32>
    %39 = tpu.matmul %38, %37, %cst_22 {dimension_numbers = #tpu.dot_dimension_numbers<[1], [0], [0], [1], [0, 0, 1, 1], [], []>} : vector<8x4xbf16>, vector<4x64xbf16>, vector<8x64xf32> -> vector<8x64xf32>
    %c0_23 = arith.constant 0 : index
    %c0_24 = arith.constant 0 : index
    %40 = vector.load %arg5[%c0_23, %c0_24] : memref<8x1xf32, #tpu.memory_space<vmem>>, vector<8x1xf32>
    %41 = vector.broadcast %40 : vector<8x1xf32> to vector<8x64xf32>
    %42 = arith.addf %39, %41 : vector<8x64xf32>
    %43 = arith.addf %25, %42 : vector<8x64xf32>
    %c0_25 = arith.constant 0 : index
    %c0_26 = arith.constant 0 : index
    %c0_27 = arith.constant 0 : index
    %44 = vector.load %arg8[%c0_25, %c0_26, %c0_27] : memref<1x8x64xf32, #tpu.memory_space<vmem>>, vector<1x8x64xf32>
    %45 = vector.shape_cast %44 : vector<1x8x64xf32> to vector<8x64xf32>
    %46 = vector.shape_cast %43 : vector<8x64xf32> to vector<1x8x64xf32>
    tpu.vector_store %arg8[%c0_25, %c0_26, %c0_27], %46 {strides = array<i32>} : memref<1x8x64xf32, #tpu.memory_space<vmem>>, vector<1x8x64xf32>,
    return
  }
  func.func @transform_0(%arg0: i32) -> (i32, i32, i32) {
    %c0_i32 = arith.constant 0 : i32
    %c0_i32_0 = arith.constant 0 : i32
    %c0_i32_1 = arith.constant 0 : i32
    return %arg0, %c0_i32, %c0_i32_0 : i32, i32, i32
  }
  func.func @transform_1(%arg0: i32) -> (i32, i32, i32) {
    %c0_i32 = arith.constant 0 : i32
    %c0_i32_0 = arith.constant 0 : i32
    %c0_i32_1 = arith.constant 0 : i32
    return %arg0, %c0_i32, %c0_i32_0 : i32, i32, i32
  }
  func.func @transform_2(%arg0: i32) -> (i32, i32) {
    %c0_i32 = arith.constant 0 : i32
    %c0_i32_0 = arith.constant 0 : i32
    %c0_i32_1 = arith.constant 0 : i32
    return %c0_i32, %c0_i32_0 : i32, i32
  }
  func.func @transform_3(%arg0: i32) -> (i32, i32) {
    %c0_i32 = arith.constant 0 : i32
    %c0_i32_0 = arith.constant 0 : i32
    %c0_i32_1 = arith.constant 0 : i32
    return %c0_i32, %c0_i32_0 : i32, i32
  }
  func.func @transform_4(%arg0: i32) -> (i32, i32) {
    %c0_i32 = arith.constant 0 : i32
    %c0_i32_0 = arith.constant 0 : i32
    %c0_i32_1 = arith.constant 0 : i32
    return %c0_i32, %c0_i32_0 : i32, i32
  }
  func.func @transform_5(%arg0: i32) -> (i32, i32) {
    %c0_i32 = arith.constant 0 : i32
    %c0_i32_0 = arith.constant 0 : i32
    %c0_i32_1 = arith.constant 0 : i32
    return %c0_i32, %c0_i32_0 : i32, i32
  }
  func.func @transform_6(%arg0: i32) -> (i32, i32) {
    %c0_i32 = arith.constant 0 : i32
    %c0_i32_0 = arith.constant 0 : i32
    %c0_i32_1 = arith.constant 0 : i32
    return %c0_i32, %c0_i32_0 : i32, i32
  }
  func.func @transform_7(%arg0: i32) -> (i32, i32, i32) {
    %c0_i32 = arith.constant 0 : i32
    %c0_i32_0 = arith.constant 0 : i32
    %c0_i32_1 = arith.constant 0 : i32
    return %arg0, %c0_i32, %c0_i32_0 : i32, i32, i32
  }
}

</mosaic_0001>

<bundles_post_ra>
// kernel: tpu_custom_call.1
= control target key start
LH: loop header
LB: loop body
LE: loop exit
PB: predicated region body
PF: predicated region fallthrough
CT: control target
= control target key end

     0   :  { %12 = vsyncpa [#allocation3], 0  ;;  %s1357_s0 = inlined_call_operand.vmem [shape: bf16[2,36,64], index: 0, kind: input, shape index: {}]   ;;  %s1358_s1 = inlined_call_operand.vmem [shape: bf16[2,64,16], index: 1, kind: input, shape index: {}]   ;;  %s1359_s2 = inlined_call_operand.vmem [shape: bf16[8,36], index: 2, kind: input, shape index: {}]   ;;  %s1360_s3 = inlined_call_operand.vmem [shape: bf16[8,4], index: 3, kind: input, shape index: {}]   ;;  %s1361_s4 = inlined_call_operand.vmem [shape: f32[8,1], index: 4, kind: input, shape index: {}]   ;;  %s1362_s5 = inlined_call_operand.vmem [shape: bf16[16,8], index: 5, kind: input, shape index: {}]   ;;  %s1363_s6 = inlined_call_operand.vmem [shape: bf16[8,16], index: 6, kind: input, shape index: {}]   ;;  %s1364_s7 = inlined_call_operand.hbm [shape: f32[2,8,64], index: 7, kind: output, shape index: {}]  }
   0x1   :  { %14 = vsyncpa [#allocation3 + $0x1], 0  ;;  %s1196_s24 = smov 0   ;;  %s1198_s25 = smov 0  }
   0x2   :  { %s1200_s26 = smov 0   ;;  %s1202_s27 = smov 0  }
   0x3 LB: > { %s1217_s28 = sadd.s32 4294967295, %s1141_s27   ;;  %s918_s29 = sadd.s32 4294967294, %s1141_s27   ;;  %s1141_s27 = sphi %s1202_s27, %s1370_s27   ;;  %s1137_s26 = sphi %s1200_s26, %s1369_s26   ;;  %s1133_s25 = sphi %s1198_s25, %s1368_s25   ;;  %s1129_s24 = sphi %s1196_s24, %s1367_s24  }
   0x4   : > { %s1221_s30 = sadd.s32 1, %s1141_s27   ;;  %s184_s8 = sadd.s32 1, %s1137_s26 }
   0x5   : > { %s181_s9 = ssub.s32 %s1141_s27, %s1221_s30  ;;  %p194_p0 = scmp.ne.s32.totalorder %s1137_s26, %s1133_s25 }
   0x6   : > { %p182_p1 = scmp.eq.s32.totalorder %s181_s9, 0  ;;  %p195_p2 = scmp.eq.s32.totalorder %s1217_s28, 1 }
   0x7   : > { %p200_p3 = scmp.ne.s32.totalorder %s1133_s25, %s1129_s24  ;;  %p201_p4 = scmp.eq.s32.totalorder %s918_s29, 1 }
   0x8   : > { %s1232_s10 = scalar_select %p182_p1, %s1137_s26, %s184_s8  }
   0x9   : > { %p1234_p5 = por %p195_p2, %p194_p0  ;;  %p1238_p6 = por %p201_p4, %p200_p3 }
   0xa   : > { %p921_p7 = scmp.ge.s32.totalorder %s1141_s27, 1  ;;  %p250_p8 = scmp.lt.s32.totalorder %s1141_s27, 3 }
   0xc   : > { %p251_p9 = pnand %p921_p7, %p250_p8 }
   0xd   : > { %p287_p10 = scmp.lt.s32.totalorder (!%p251_p9), %s1217_s28, 1  ;;  %s1147_s14 = smov (!%p251_p9), 32  }
   0xe   : > { %254 = sbr.rel (%p251_p9) target bundleno = 783 (0x30f), region = 48  ;;  %s1151_s18 = smov (!%p251_p9), 48  }
   0xf   : > { %s1152_s19 = smov (!%p251_p9), 40   ;;  %s284_s8 = sand.u32 (!%p251_p9), 1, %s1133_s25  }
  0x10   : > { %s922_s9 = sshll.u32 (!%p251_p9), %s284_s8, 3  ;;  %s945_s13 = sshll.u32 (!%p251_p9), %s1217_s28, 7 }
  0x13   : > { %v1071_v0 = vld [vmem:[%s1362_s5] sm:$0xff]   ;;  %s288_s15 = scalar_select %p287_p10, %s1217_s28, 1  ;;  %v1143_v1 = vmov 0.0   ;;  %vm421_vm0 = vcmask 130048   ;;  %vm323_vm1 = vcmask 1041408   ;;  %vm1144_vm2 = vmmov 0  }
  0x14   : > { %978 = vmatprep.subr.bf16.mxu1 %v1071_v0  ;;  %968 = vmatprep.subr.bf16.mxu0 %v1143_v1  ;;  %v298_v10 = vld [vmem:[%s1359_s2] sm:$0xf]  ;;  %vm319_vm3 = vcmask 293888   ;;  %v1145_v29 = vmov 1983009808   ;;  %v672_v31 = vlaneseq  ;;  %vm367_vm4 = vcmask 523264  }
  0x15   : > { %979 = vmatpush3.bf16.msra.mxu1 %v1071_v0  ;;  %s948_s16 = sshll.u32 %s288_s15, 5  ;;  %s1018_s17 = smul.u32 20, %s288_s15  ;;  %974 = vmatprep.mubr.msk.bf16.mxu0 %vm1144_vm2, %v1143_v1  ;;  %v503_v17 = vld [vmem:[%s1363_s6] sm:$0xf]  ;;  %v670_v30 = vunpack.c.l.s4 %v1145_v29  ;;  %v1146_v36 = vmov 1934713408  }
  0x16   : > { %994 = vmatprep.subr.bf16.mxu1 %v1143_v1  ;;  %s296_s20 = scalar_lea.vmem %s1358_s1, %s948_s16  ;;  %v702_v37 = vunpack.c.l.s4 %v1146_v36  ;;  %v673_v39 = vshrl.u32 %v672_v31, 7  ;;  %s1148_s15 = smov 16   ;;  %vm763_vm5 = vcmask 64512   ;;  %vm766_vm6 = vcmask 195584  }
  0x17   : > { %v1072_v2 = vld [vmem:[%s296_s20] sm:$0xff]   ;;  %v1073_v3 = vld [vmem:[%s296_s20 + $0x8] sm:$0xff]   ;;  %s291_s23 = scalar_lea.vmem %s1357_s0, %s1018_s17  ;;  %v1074_v4 = vld [vmem:[%s296_s20 + $0x10] sm:$0xff]   ;;  %v671_v38 = vunpack.c.0.s8 %v670_v30  ;;  %s1149_s16 = smov 24   ;;  %vm768_vm7 = vcmask 261120   ;;  %vm770_vm8 = vcmask 326656  }
  0x18   : > { %980 = vmatprep.mubr.msk.bf16.mxu1 %vm421_vm0, %v1072_v2  ;;  %v1076_v5 = vld [vmem:[%s291_s23 + $0x10] ss:$0 sps:$4 sm:$0x33]   ;;  %v1075_v7 = vld [vmem:[%s296_s20 + $0x18] sm:$0xff]   ;;  %v1077_v8 = vld [vmem:[%s291_s23 + $0x8] sm:$0xff]   ;;  %v703_v44 = vunpack.c.0.s8 %v702_v37  ;;  %s1150_s17 = smov 8  }
  0x19   : > { %981 = vmatmul.mubr.msk.bf16.vlgmr.msra.gmra.mxu1 %vm421_vm0, %v1073_v3  ;;  %v325_v6 = vsel %vm323_vm1, %v1076_v5, 0  ;;  %v1078_v9 = vld [vmem:[%s291_s23] sm:$0xff]   ;;  %v674_v45 = vsub.s32 %v671_v38, %v673_v39  ;;  %s1153_s20 = smov 56   ;;  %vm772_vm9 = vcmask 392192   ;;  %vm774_vm10 = vcmask 457728   ;;  %s834_s28 = scalar_lea.sflag [#allocation3], %s284_s8 }
  0x1a   : > { %984 = vmatprep.mubr.msk.bf16.mxu1 %vm421_vm0, %v1074_v4  ;;  %969 = vmatpush3.bf16.msra.mxu0 %v325_v6  ;;  %v706_v54 = vsub.s32 %v703_v44, %v673_v39  ;;  %vm784_vm11 = vcmask 31744  }
  0x1b   : > { %970 = vmatprep.subr.bf16.mxu0 %v1143_v1 }
  0x1e   : > { %971 = vmatpush3.bf16.msra.mxu0 %v1077_v8 }
  0x1f   : > { %972 = vmatprep.subr.bf16.mxu0 %v1143_v1 }
  0x21   : > { %985 = vmatmul.mubr.msk.bf16.gmra.mxu1 %vm421_vm0, %v1075_v7 }
  0x22   : > { %973 = vmatpush3.bf16.msra.mxu0 %v1078_v9  ;;  %996 = vmatprep.mubr.msk.bf16.mxu1 %vm1144_vm2, %v1143_v1 }
  0x23   : > { %988 = vmatprep.subr.bf16.mxu0 %v1143_v1 }
  0x25   : > { %975 = vmatmul.mubr.msk.bf16.vlgmr.msra.gmra.mxu0 %vm319_vm3, %v298_v10 }
  0x26   : > { %990 = vmatprep.mubr.msk.bf16.mxu0 %vm1144_vm2, %v1143_v1 }
  0xd9   : > { %v982_v11 = vpop.f32.mrf.mxu1 }
  0xdb   : > { %v468_v12 = vpop.f32.mrf.mxu1 }
  0xdd   : > { %v983_v13 = vpop.f32.mrf.mxu1 }
  0xde   : > { %v500_v14 = vpack.c.bf16 %v983_v13, %v982_v11 }
  0xdf   : > { %v471_v15 = vpop.f32.mrf.mxu1 }
  0xe0   : > { %v499_v16 = vpack.c.bf16 %v471_v15, %v468_v12  ;;  %995 = vmatpush3.bf16.msra.mxu1 %v500_v14  ;;  %v1154_v14 = vmov 0   ;;  %v778_v15 = vld [vmem:[%s1361_s4] sm:$0xff] }
  0xe1   : > { %v986_v18 = vpop.f32.mrf.mxu1  ;;  %1006 = vmatprep.subr.bf16.mxu1 %v1143_v1  ;;  %1070 = vset.pattern.permute.xlu0 %v1154_v14 }
  0xe2   : > { %989 = vmatpush3.bf16.msra.mxu0 %v499_v16 }
  0xe3   : > { %v484_v19 = vpop.f32.mrf.mxu1  ;;  %997 = vmatmul.mubr.msk.bf16.vlgmr.msra.gmra.mxu1 %vm421_vm0, %v503_v17  ;;  %1000 = vmatprep.subr.bf16.mxu0 %v1143_v1 }
  0xe4   : > { %1008 = vmatprep.mubr.msk.bf16.mxu1 %vm1144_vm2, %v1143_v1 }
  0xe5   : > { %v987_v20 = vpop.f32.mrf.mxu1  ;;  %991 = vmatmul.mubr.msk.bf16.vlgmr.msra.gmra.mxu0 %vm421_vm0, %v503_v17  ;;  %v1290_v24 = vpop.f32.mrf.mxu0 }
  0xe6   : > { %v502_v21 = vpack.c.bf16 %v987_v20, %v986_v18  ;;  %1002 = vmatprep.mubr.msk.bf16.mxu0 %vm1144_vm2, %v1143_v1  ;;  %v372_v11 = vmul.f32 %v1290_v24, %v1290_v24  ;;  %v368_v13 = vsel %vm367_vm4, %v1290_v24, 0.0 }
  0xe7   : > { %v487_v22 = vpop.f32.mrf.mxu1  ;;  %v976_v25 = vpop.f32.mrf.mxu0 }
  0xe8   : > { %v501_v23 = vpack.c.bf16 %v487_v22, %v484_v19  ;;  %1007 = vmatpush3.bf16.msra.mxu1 %v502_v21  ;;  %v373_v12 = vsel %vm367_vm4, %v372_v11, 0.0 }
  0xe9   : > { %v364_v26 = vpop.f32.mrf.mxu0 }
  0xea   : > { %1001 = vmatpush3.bf16.msra.mxu0 %v501_v23 }
  0xeb   : > { %1009 = vmatmul.mubr.msk.bf16.vlgmr.msra.gmra.mxu1 %vm421_vm0, %v503_v17  ;;  %1012 = vmatprep.subr.bf16.mxu0 %v1143_v1  ;;  %v977_v27 = vpop.f32.mrf.mxu0 }
  0xed   : > { %1003 = vmatmul.mubr.msk.bf16.vlgmr.msra.gmra.mxu0 %vm421_vm0, %v503_v17 }
  0xee   : > { %1014 = vmatprep.mubr.msk.bf16.mxu0 %vm1144_vm2, %v1143_v1 }
 0x1a3   : > { %v581_v28 = vpop.f32.mrf.mxu1 }
 0x1a5   : > { %v541_v32 = vpop.f32.mrf.mxu0  ;;  %v998_v33 = vpop.f32.mrf.mxu1 }
 0x1a7   : > { %v992_v34 = vpop.f32.mrf.mxu0  ;;  %v584_v35 = vpop.f32.mrf.mxu1 }
 0x1a9   : > { %v544_v40 = vpop.f32.mrf.mxu0  ;;  %v999_v41 = vpop.f32.mrf.mxu1 }
 0x1ab   : > { %v993_v42 = vpop.f32.mrf.mxu0  ;;  %v661_v43 = vpop.f32.mrf.mxu1 }
 0x1ac   : > { %v683_v46 = vcombine.low %v581_v28, %v661_v43  ;;  %v684_v47 = vcombine.high %v581_v28, %v661_v43 }
 0x1ad   : > { %v621_v48 = vpop.f32.mrf.mxu0  ;;  %v1010_v49 = vpop.f32.mrf.mxu1 }
 0x1ae   : > { %v667_v50 = vcombine.low %v541_v32, %v621_v48  ;;  %v668_v51 = vcombine.high %v541_v32, %v621_v48  ;;  %v691_v55 = vrot.slane %v683_v46, %v674_v45  ;;  %v698_v56 = vrot.slane %v684_v47, %v674_v45  ;;  %v777_v32 = vld [vmem:[%s1360_s3] sm:$0xf] }
 0x1af   : > { %v1004_v52 = vpop.f32.mrf.mxu0  ;;  %v664_v53 = vpop.f32.mrf.mxu1 }
 0x1b0   : > { %v675_v57 = vrot.slane %v667_v50, %v674_v45  ;;  %v682_v58 = vrot.slane %v668_v51, %v674_v45 }
 0x1b1   : > { %v624_v59 = vpop.f32.mrf.mxu0  ;;  %v1011_v60 = vpop.f32.mrf.mxu1 }
 0x1b2   : > { %v699_v61 = vcombine.low %v675_v57, %v691_v55  ;;  %v715_v62 = vcombine.low %v682_v58, %v698_v56  ;;  %v700_v63 = vcombine.high %v675_v57, %v691_v55  ;;  %v716_v5 = vcombine.high %v682_v58, %v698_v56 }
 0x1b3   : > { %v1005_v0 = vpop.f32.mrf.mxu0 }
 0x1b4   : > { %v723_v2 = vrot.slane %v715_v62, %v706_v54  ;;  %v714_v3 = vrot.slane %v700_v63, %v706_v54  ;;  %v707_v4 = vrot.slane %v699_v61, %v706_v54  ;;  %v730_v9 = vrot.slane %v716_v5, %v706_v54 }
 0x1b6   : > { %748 = vrot.lane.b32.xlu1 %v723_v2, %s1147_s14  ;;  %740 = vrot.lane.b32.xlu0 %v714_v3, %s1148_s15  ;;  %v732_v6 = vcombine.high %v714_v3, %v1143_v1  ;;  %v731_v7 = vcombine.high %v707_v4, %v1143_v1  ;;  %v733_v8 = vcombine.high %v723_v2, %v1143_v1  ;;  %s286_s14 = scalar_lea.vmem [#allocation2], %s922_s9 }
 0x1b7   : > { %v734_v10 = vcombine.high %v730_v9, %v1143_v1  ;;  %s847_s15 = sshll.u32 %s286_s14, 4  ;;  %s1317_s15 = int_to_ptr.vmem [resolvable:$true] %s847_s15 }
 0x1ba   : > { %744 = vrot.lane.b32.xlu1 %v732_v6, %s1149_s16  ;;  %736 = vrot.lane.b32.xlu0 %v731_v7, %s1150_s17 }
 0x1be   : > { %756 = vrot.lane.b32.xlu1 %v730_v9, %s1151_s18  ;;  %752 = vrot.lane.b32.xlu0 %v733_v8, %s1152_s19  ;;  %s1315_s18 = scalar_lea.hbm %s1364_s7, %s945_s13  ;;  %s1081_s19 = scalar_lea.vmem %s1317_s15, 128 }
 0x1bf   : > { %p1082_p11 = scmp.ne.s32.totalorder %s1317_s15, %s1081_s19 }
 0x1c1   : > { %p1083_p12 = pnand %p1082_p11, %p1234_p5 }
 0x1c2   : > { %760 = vrot.lane.b32.xlu0 %v734_v10, %s1153_s20  ;;  %s1155_s20 = smov [#allocation2]  }
 0x1c3   : > { %p1084_p13 = pneg %p1083_p12  ;;  %s1085_s21 = sshll.u32 %s1155_s20, 4  ;;  %s1086_s21 = int_to_ptr.vmem [resolvable:$false] %s1085_s21 }
 0x1c4   : > { %s1087_s22 = scalar_lea.vmem %s1086_s21, 256  ;;  %p1088_p0 = scmp.lt.s32.totalorder %s1317_s15, %s1086_s21 }
 0x1c5   : > { %p1089_p1 = scmp.lt.s32.totalorder %s1087_s22, %s1081_s19 }
 0x1c7   : > { %p1090_p2 = por %p1089_p1, %p1088_p0 }
 0x1c9   : > { %p1091_p3 = pnand %p1090_p2, %p1084_p13 }
 0x1e1   : > { %374 = vadd.xlane.f32.xlu0 %v373_v12 }
 0x1e2   : > { %369 = vadd.xlane.f32.xlu1 %v368_v13 }
 0x1f7   : > { %781 = vperm.xlu0 %1070, %v778_v15  }
 0x228   : > { %v749_v1 = vpop.permute.xlu1 %748  ;;  %v741_v16 = vpop.permute.xlu0 %740 }
 0x22c   : > { %v745_v17 = vpop.permute.xlu1 %744  ;;  %v737_v18 = vpop.permute.xlu0 %736 }
 0x22d   : > { %v764_v19 = vsel %vm763_vm5, %v707_v4, %v737_v18 }
 0x22e   : > { %v765_v20 = vsel %vm421_vm0, %v764_v19, %v741_v16 }
 0x22f   : > { %v767_v21 = vsel %vm766_vm6, %v765_v20, %v745_v17 }
 0x230   : > { %v769_v22 = vsel %vm768_vm7, %v767_v21, %v749_v1  ;;  %v753_v23 = vpop.permute.xlu0 %752  ;;  %v757_v25 = vpop.permute.xlu1 %756 }
 0x231   : > { %v771_v26 = vsel %vm770_vm8, %v769_v22, %v753_v23 }
 0x232   : > { %v773_v27 = vsel %vm772_vm9, %v771_v26, %v757_v25 }
 0x234   : > { %v761_v28 = vpop.permute.xlu0 %760 }
 0x235   : > { %v775_v29 = vsel %vm774_vm10, %v773_v27, %v761_v28 }
 0x236   : > { %v776_v30 = vpack.c.bf16 %v775_v29, %v775_v29 }
 0x238   : > { %v789_v31 = vsel %vm323_vm1, %v776_v30, 0 }
 0x239   : > { %1013 = vmatpush3.bf16.msra.mxu0 %v789_v31 }
 0x23c   : > { %1015 = vmatmul.mubr.msk.bf16.vlgmr.msra.gmra.mxu0 %vm784_vm11, %v777_v32 }
 0x26a   : > { %v375_v35 = vpop.xlane.xlu0 %374 }
 0x26b   : > { %v370_v33 = vpop.xlane.xlu1 %369  ;;  %v376_v37 = vmul.f32 0.015625, %v375_v35 }
 0x26c   : > { %v371_v34 = vmul.f32 0.015625, %v370_v33 }
 0x26e   : > { %v377_v36 = vmul.f32 %v371_v34, %v371_v34  ;;  %v380_v42 = vsub.f32 %v1290_v24, %v371_v34 }
 0x270   : > { %v378_v38 = vsub.f32 %v376_v37, %v377_v36 }
 0x272   : > { %v379_v39 = vmax.f32 %v378_v38, 0.0  ;;  %v782_v44 = vpop.permute.xlu0 %781 }
 0x274   : > { %v381_v40 = vadd.f32 1e-05, %v379_v39 }
 0x276   : > { %1079 = vrsqrt.f32 %v381_v40 }
 0x283   : > { %v1080_v41 = vpop.eup %1079 }
 0x284   : > { %v383_v43 = vmul.f32 %v1080_v41, %v380_v42 }
 0x286   : > { %v384_v46 = vmax.f32 %v383_v43, 0.0 }
 0x2fc   : > { %v825_v45 = vpop.f32.mrf.mxu0 }
 0x2fd   : > { %v826_v47 = vadd.f32 %v825_v45, %v782_v44 }
 0x2fe   : > { %v1016_v48 = vpop.f32.mrf.mxu0 }
 0x2ff   : > { %v831_v49 = vadd.f32 %v826_v47, %v384_v46 }
 0x300   : > { %v828_v24 = vpop.f32.mrf.mxu0 }
 0x301   : > { %832 = vst.msk [vmem:[%s286_s14] sm:$0xff] %vm367_vm4, %v831_v49 }
 0x302   : > { %v1017_v50 = vpop.f32.mrf.mxu0 }
 0x303   : > { %1094 = shalt.err (!%p1091_p3)
}
 0x304   : > { %s1095_s23 = scalar_lea.hbm %s1315_s18, 128  ;;  %s1099_s9 = scalar_lea.hbm %s1364_s7, 256 }
 0x305   : > { %p1096_p4 = scmp.ne.s32.totalorder %s1315_s18, %s1095_s23  ;;  %p1100_p9 = scmp.lt.s32.totalorder %s1315_s18, %s1364_s7 }
 0x306   : > { %p1101_p10 = scmp.lt.s32.totalorder %s1099_s9, %s1095_s23 }
 0x307   : > { %p1097_p7 = pnand %p1096_p4, %p1234_p5 }
 0x308   : > { %p1102_p11 = por %p1101_p10, %p1100_p9 }
 0x309   : > { %p1098_p8 = pneg %p1097_p7 }
 0x30b   : > { %p1103_p12 = pnand %p1102_p11, %p1098_p8 }
 0x30d   : > { %1106 = shalt.err (!%p1103_p12)
}
 0x30e   : > { %1019 = dma.vmem_to_hbm [thread:$0]  (%p1234_p5), %s1317_s15, 128, %s1315_s18, %s834_s28  }
 0x30f PF: > { %p1025_p13 = scmp.ge.s32.totalorder %s1141_s27, 2  ;;  %s859_s16 = sand.u32 1, %s1129_s24  }
 0x310   : > { %s860_s17 = scalar_lea.sflag [#allocation3], %s859_s16 }
 0x311   : > { %p1022_p0 = pnand %p1025_p13, %p1238_p6 }
 0x313   : > { %p1023_p1 = pneg %p1022_p0 }
 0x315   : > { %1124 = dma.done.wait (%p1023_p1), %s860_s17, 128  }
 0x316   : > { %1126 = vsyncadd (%p1023_p1), %s860_s17, 4294967168  ;;  %p17_p2 = scmp.ge.s32.totalorder %s1221_s30, 4   ;;  %s1367_s24 = smov %s1133_s25 }
 0x317   : > { %s1368_s25 = smov %s1137_s26  ;;  %s1369_s26 = smov %s1232_s10 }
 0x318   : > { %s1370_s27 = smov %s1221_s30  ;;  %19 = sbr.rel (!%p17_p2) target bundleno = 3 (0x3), region = 86 }
 0x31d   :  { %865 = vsyncpa [#allocation3], 1 }
 0x31e   :  { %867 = vsyncpa [#allocation3 + $0x1], 1 }

</bundles_post_ra>
